<compile_context>
chip_gen: v7x
topology: tpu7x:2x2x1
jax: 0.10.0
libtpu: 0.0.40
codegen_flags: <defaults>
</compile_context>

<pallas_src>
import functools

import jax
import jax.numpy as jnp
from jax import lax
from jax.experimental import pallas as pl
from jax.experimental.pallas import tpu as pltpu


# ----------------------------------------------------------------------------
# Pallas kernel: one (batch block, output-pixel tile) per grid step.
# ----------------------------------------------------------------------------
def _grid_sample_kernel(grid_ref, x_ref, o_ref, *, H, W, C, B):
    CH = C * H
    T = grid_ref.shape[2]

    # Hoisted constants: emitted once per grid step, shared by all B images.
    col_idx = lax.broadcasted_iota(jnp.int32, (W, T), 0).astype(jnp.float32)
    row_idx = lax.broadcasted_iota(jnp.int32, (H, T), 0).astype(jnp.float32)
    # Channel selector: sel[c, r] = 1 iff row r of the (C*H, T) slab belongs to
    # channel c.  Moves the over-H channel reduction onto the MXU (one matmul)
    # instead of C separate cross-sublane (XLU) sums + concatenate.
    r_idx = lax.broadcasted_iota(jnp.int32, (C, CH), 1)
    c_idx = lax.broadcasted_iota(jnp.int32, (C, CH), 0)
    sel = ((r_idx >= c_idx * H) & (r_idx < (c_idx + 1) * H)).astype(jnp.float32)

    for b in range(B):                                   # static unroll
        g = grid_ref[b]                                  # (2, T)
        # Unnormalize to pixel space (align_corners=False convention).
        ix = ((g[0:1, :] + 1.0) * W - 1.0) * 0.5         # (1, T)
        iy = ((g[1:2, :] + 1.0) * H - 1.0) * 0.5         # (1, T)

        # Separable bilinear tents; OOB corners get weight 0 == zeros padding.
        col_w = jnp.maximum(1.0 - jnp.abs(ix - col_idx), 0.0)   # (W, T)
        row_w = jnp.maximum(1.0 - jnp.abs(iy - row_idx), 0.0)   # (H, T)

        # Stage 1 (MXU): contract over W for all channels/rows at once.
        tmp = jnp.dot(x_ref[b].astype(jnp.float32), col_w,
                      preferred_element_type=jnp.float32)        # (CH, T)

        # Stage 2 (MXU): row-tent weighting + per-channel reduction over H.
        # (concat of C aligned (H,T) slabs; only a relayout hazard if H%8 != 0)
        row_w_all = jnp.concatenate([row_w] * C, axis=0)         # (CH, T)
        out = jnp.dot(sel, tmp * row_w_all,
                      preferred_element_type=jnp.float32)        # (C, T)

        o_ref[b] = out.astype(o_ref.dtype)               # lane-dense store


# ----------------------------------------------------------------------------
# Tiling / batching plan: generation-aware VMEM budget, full working-set
# accounting, lane-dense (multiple-of-128) pixel tiles with padding fallback,
# batch blocking for small images, and >=2 grid steps for dual-core parts.
# ----------------------------------------------------------------------------
def _plan(N, C, H, W):
    MiB = 1024 * 1024
    HW = H * W
    CH = C * H

    try:
        vmem_phys = pltpu.get_tpu_info().vmem_capacity_bytes
    except Exception:  # pragma: no cover - conservative fallback
        vmem_phys = 64 * MiB

    if vmem_phys >= 100 * MiB:          # v5e / v6e: 128 MiB physical VMEM
        budget, cap_t, vmem_limit = 48 * MiB, 4096, 80 * MiB
    else:                               # v7x: 64 MiB physical per TensorCore
        budget, cap_t, vmem_limit = 20 * MiB, 2048, 40 * MiB

    # Batch block: amortize fixed per-grid-step overhead on small images.
    B = 1
    if HW <= 4096:
        for cand in range(min(8, N), 0, -1):
            if N % cand == 0:
                B = cand
                break

    def ws_bytes(T, Bb):
        # Full per-step f32 working set (double-buffered streams + scratch).
        return 4 * (2 * Bb * CH * W       # x block (double-buffered)
                    + 2 * Bb * 2 * T      # grid tile (double-buffered)
                    + 2 * Bb * C * T      # out tile (double-buffered)
                    + 2 * CH * T          # stage-1 tmp + row-weighted copy
                    + (H + W) * T         # separable tent weights
                    + C * CH)             # channel-selector matrix

    def round128(v):
        return -(-v // 128) * 128

    # Largest lane-dense tile within budget & cap.
    T = max(128, min(cap_t, round128(HW)))
    while T > 128 and ws_bytes(T, B) > budget:
        T -= 128
    while B > 1 and ws_bytes(T, B) > budget:
        B = next(d for d in range(B - 1, 0, -1) if N % d == 0)
    # TODO(synk): if the whole image block alone exceeds the VMEM budget
    # (multi-megapixel inputs), a row-tiled variant of x would be needed.

    if T >= HW:
        T = HW if HW <= 128 else round128(HW)   # single tile (pad if needed)
    else:
        # Prefer an exact divisor of HW (no padded pixels) if one exists nearby.
        for cand in range(T, max(128, T // 2) - 1, -128):
            if HW % cand == 0:
                T = cand
                break
    HW_pad = -(-HW // T) * T
    num_tiles = HW_pad // T

    # Keep >=2 grid steps so both TensorCores get work on dual-core parts.
    if (N // B) * num_tiles < 2:
        if num_tiles == 1 and HW > 128:
            T = round128(-(-HW // 2))
            HW_pad, num_tiles = 2 * T, 2
        elif B > 1:
            for cand in range(B - 1, 0, -1):
                if N % cand == 0 and N // cand >= 2:
                    B = cand
                    break

    return B, T, HW_pad, num_tiles, vmem_limit


# ----------------------------------------------------------------------------
# Wrapper (glue): flatten layouts, pad the pixel axis, launch the grid.
# ----------------------------------------------------------------------------
def full_spatial_forward(x, xform_params):
    """x: (N, C, H, W) float; xform_params: (N, H, W, 2) float."""
    N, C, H, W = x.shape
    HW = H * W
    x_flat = x.reshape(N, C * H, W).astype(jnp.float32)                # (N, C*H, W)
    grid_flat = jnp.transpose(
        xform_params.astype(jnp.float32).reshape(N, HW, 2), (0, 2, 1))  # (N, 2, HW)

    B, T, HW_pad, num_tiles, vmem_limit = _plan(N, C, H, W)

    if HW_pad > HW:
        # Padded samples get a far-OOB coordinate -> tent weights 0 -> output 0
        # (sliced away below), so padding never changes real pixels.
        grid_flat = jnp.pad(grid_flat, ((0, 0), (0, 0), (0, HW_pad - HW)),
                            constant_values=-3.0)

    out = pl.pallas_call(
        functools.partial(_grid_sample_kernel, H=H, W=W, C=C, B=B),
        out_shape=jax.ShapeDtypeStruct((N, C, HW_pad), x.dtype),
        grid_spec=pltpu.PrefetchScalarGridSpec(
            num_scalar_prefetch=0,
            grid=(N // B, num_tiles),
            in_specs=[
                # per-tile sampling coordinates for the B images of this block
                pl.BlockSpec((B, 2, T), lambda n, j: (n, 0, j)),
                # image block stays VMEM-resident across the tile axis
                # (index_map ignores j -> no re-DMA per tile)
                pl.BlockSpec((B, C * H, W), lambda n, j: (n, 0, 0)),
            ],
            out_specs=pl.BlockSpec((B, C, T), lambda n, j: (n, 0, j)),
        ),
        compiler_params=pltpu.CompilerParams(
            dimension_semantics=("parallel", "parallel"),
            vmem_limit_bytes=vmem_limit),
    )(grid_flat, x_flat)

    return out[:, :, :HW].reshape(N, C, H, W)


# ----------------------------------------------------------------------------
# FullSpatial.identity_params: F.affine_grid with the identity affine
# (align_corners=False convention, matching the kernel above).
# ----------------------------------------------------------------------------
def identity_params(shape):
    N, _, H, W = shape
    xs = (2.0 * jnp.arange(W, dtype=jnp.float32) + 1.0) / W - 1.0
    ys = (2.0 * jnp.arange(H, dtype=jnp.float32) + 1.0) / H - 1.0
    gx = jnp.broadcast_to(xs[None, :], (H, W))
    gy = jnp.broadcast_to(ys[:, None], (H, W))
    grid = jnp.stack([gx, gy], axis=-1)              # (H, W, 2)
    return jnp.broadcast_to(grid[None], (N, H, W, 2))


# ----------------------------------------------------------------------------
# Pure-JAX reference grid_sample (bilinear, zeros padding, align_corners=False)
# used only to validate the kernel.
# ----------------------------------------------------------------------------
def grid_sample_ref(x, grid):
    N, C, H, W = x.shape
    gx = grid[..., 0]
    gy = grid[..., 1]
    ix = ((gx + 1.0) * W - 1.0) * 0.5
    iy = ((gy + 1.0) * H - 1.0) * 0.5
    x0 = jnp.floor(ix)
    y0 = jnp.floor(iy)
    out = jnp.zeros_like(x)
    n_idx = jnp.arange(N)[:, None, None, None]
    c_idx = jnp.arange(C)[None, :, None, None]
    for dx, dy in ((0, 0), (1, 0), (0, 1), (1, 1)):
        xc = x0 + dx
        yc = y0 + dy
        wx = 1.0 - jnp.abs(ix - xc)
        wy = 1.0 - jnp.abs(iy - yc)
        inb = (xc >= 0) & (xc <= W - 1) & (yc >= 0) & (yc <= H - 1)
        xi = jnp.clip(xc, 0, W - 1).astype(jnp.int32)
        yi = jnp.clip(yc, 0, H - 1).astype(jnp.int32)
        val = x[n_idx, c_idx, yi[:, None], xi[:, None]]
        out = out + val * (wx * wy * inb.astype(x.dtype))[:, None]
    return out


if __name__ == "__main__":
    key = jax.random.PRNGKey(0)
    k_img, k1, k2, k3, k4 = jax.random.split(key, 5)

    # --- primary shape (module-typical small image batch) ---
    N, C, H, W = 2, 4, 16, 16
    x = jax.random.normal(k_img, (N, C, H, W), dtype=jnp.float32)

    # Module __init__: xform_params = identity_params(img_shape)
    params_id = identity_params((N, C, H, W))

    # 1) identity grid => grid_sample is the identity map on the image
    y_id = jax.block_until_ready(full_spatial_forward(x, params_id))
    assert jnp.allclose(y_id, x, atol=1e-4, rtol=1e-4), "identity grid mismatch"

    # 2) small perturbation => compare against pure-JAX bilinear reference
    params_small = params_id + 0.05 * jax.random.normal(
        k1, params_id.shape, jnp.float32)
    y_small = jax.block_until_ready(full_spatial_forward(x, params_small))
    assert jnp.allclose(y_small, grid_sample_ref(x, params_small),
                        atol=1e-4, rtol=1e-4), "small perturbation mismatch"

    # 3) large perturbation (some samples land out of bounds => zeros padding)
    params_big = params_id + 0.6 * jax.random.normal(
        k2, params_id.shape, jnp.float32)
    y_big = jax.block_until_ready(full_spatial_forward(x, params_big))
    assert jnp.allclose(y_big, grid_sample_ref(x, params_big),
                        atol=1e-4, rtol=1e-4), "OOB / zeros-padding mismatch"

    # 4) awkward shape: HW not a multiple of 128, H not a multiple of 8,
    #    odd channel count -> exercises the padded-pixel-axis path.
    N2, C2, H2, W2 = 3, 3, 12, 20
    x2 = jax.random.normal(k3, (N2, C2, H2, W2), dtype=jnp.float32)
    params2 = identity_params((N2, C2, H2, W2)) + 0.3 * jax.random.normal(
        k4, (N2, H2, W2, 2), jnp.float32)
    y2 = jax.block_until_ready(full_spatial_forward(x2, params2))
    assert jnp.allclose(y2, grid_sample_ref(x2, params2),
                        atol=1e-4, rtol=1e-4), "padded / odd-shape mismatch"

    print("KERNEL_OK")
</pallas_src>

<mosaic_0001>
module attributes {stable_mosaic.version = 11 : i64} {
  func.func @_grid_sample_kernel(%arg0: i32, %arg1: i32, %arg2: memref<2x2x128xf32, #tpu.memory_space<vmem>>, %arg3: memref<2x64x16xf32, #tpu.memory_space<vmem>>, %arg4: memref<2x4x128xf32, #tpu.memory_space<vmem>>) attributes {dimension_semantics = [#tpu.dimension_semantics<parallel>, #tpu.dimension_semantics<parallel>], iteration_bounds = array<i64: 1, 2>, scalar_prefetch = 0 : i64, scratch_operands = 0 : i64, tpu.core_type = #tpu.core_type<tc>, window_params = [{transform_indices = @transform_0, window_bounds = array<i64: 2, 2, 128>}, {transform_indices = @transform_1, window_bounds = array<i64: 2, 64, 16>}, {transform_indices = @transform_2, window_bounds = array<i64: 2, 4, 128>}]} {
    %0 = tpu.iota {dimensions = array<i32: 0>} : vector<16x128xi32>
    %1 = arith.sitofp %0 : vector<16x128xi32> to vector<16x128xf32>
    %2 = tpu.iota {dimensions = array<i32: 0>} : vector<16x128xi32>
    %3 = arith.sitofp %2 : vector<16x128xi32> to vector<16x128xf32>
    %4 = tpu.iota {dimensions = array<i32: 1>} : vector<4x64xi32>
    %5 = tpu.iota {dimensions = array<i32: 0>} : vector<4x64xi32>
    %c16_i32 = arith.constant 16 : i32
    %6 = vector.broadcast %c16_i32 : i32 to vector<4x64xi32>
    %7 = arith.muli %5, %6 : vector<4x64xi32>
    %8 = arith.cmpi sge, %4, %7 : vector<4x64xi32>
    %c1_i32 = arith.constant 1 : i32
    %9 = vector.broadcast %c1_i32 : i32 to vector<4x64xi32>
    %10 = arith.addi %5, %9 : vector<4x64xi32>
    %c16_i32_0 = arith.constant 16 : i32
    %11 = vector.broadcast %c16_i32_0 : i32 to vector<4x64xi32>
    %12 = arith.muli %10, %11 : vector<4x64xi32>
    %13 = arith.cmpi slt, %4, %12 : vector<4x64xi32>
    %14 = arith.andi %8, %13 : vector<4x64xi1>
    %15 = arith.extui %14 : vector<4x64xi1> to vector<4x64xi32>
    %16 = arith.sitofp %15 : vector<4x64xi32> to vector<4x64xf32>
    %c0 = arith.constant 0 : index
    %c0_1 = arith.constant 0 : index
    %c0_2 = arith.constant 0 : index
    %17 = vector.load %arg2[%c0, %c0_1, %c0_2] : memref<2x2x128xf32, #tpu.memory_space<vmem>>, vector<1x2x128xf32>
    %18 = vector.shape_cast %17 : vector<1x2x128xf32> to vector<2x128xf32>
    %19 = vector.extract_strided_slice %18 {offsets = [0, 0], sizes = [1, 128], strides = [1, 1]} : vector<2x128xf32> to vector<1x128xf32>
    %cst = arith.constant 1.000000e+00 : f32
    %20 = vector.broadcast %cst : f32 to vector<1x128xf32>
    %21 = arith.addf %19, %20 : vector<1x128xf32>
    %cst_3 = arith.constant 1.600000e+01 : f32
    %22 = vector.broadcast %cst_3 : f32 to vector<1x128xf32>
    %23 = arith.mulf %21, %22 : vector<1x128xf32>
    %cst_4 = arith.constant 1.000000e+00 : f32
    %24 = vector.broadcast %cst_4 : f32 to vector<1x128xf32>
    %25 = arith.subf %23, %24 : vector<1x128xf32>
    %cst_5 = arith.constant 5.000000e-01 : f32
    %26 = vector.broadcast %cst_5 : f32 to vector<1x128xf32>
    %27 = arith.mulf %25, %26 : vector<1x128xf32>
    %28 = vector.extract_strided_slice %18 {offsets = [1, 0], sizes = [1, 128], strides = [1, 1]} : vector<2x128xf32> to vector<1x128xf32>
    %cst_6 = arith.constant 1.000000e+00 : f32
    %29 = vector.broadcast %cst_6 : f32 to vector<1x128xf32>
    %30 = arith.addf %28, %29 : vector<1x128xf32>
    %cst_7 = arith.constant 1.600000e+01 : f32
    %31 = vector.broadcast %cst_7 : f32 to vector<1x128xf32>
    %32 = arith.mulf %30, %31 : vector<1x128xf32>
    %cst_8 = arith.constant 1.000000e+00 : f32
    %33 = vector.broadcast %cst_8 : f32 to vector<1x128xf32>
    %34 = arith.subf %32, %33 : vector<1x128xf32>
    %cst_9 = arith.constant 5.000000e-01 : f32
    %35 = vector.broadcast %cst_9 : f32 to vector<1x128xf32>
    %36 = arith.mulf %34, %35 : vector<1x128xf32>
    %37 = vector.broadcast %27 : vector<1x128xf32> to vector<16x128xf32>
    %38 = arith.subf %37, %1 : vector<16x128xf32>
    %39 = math.absf %38 : vector<16x128xf32>
    %cst_10 = arith.constant 1.000000e+00 : f32
    %40 = vector.broadcast %cst_10 : f32 to vector<16x128xf32>
    %41 = arith.subf %40, %39 : vector<16x128xf32>
    %cst_11 = arith.constant 0.000000e+00 : f32
    %42 = vector.broadcast %cst_11 : f32 to vector<16x128xf32>
    %43 = arith.maximumf %41, %42 : vector<16x128xf32>
    %44 = vector.broadcast %36 : vector<1x128xf32> to vector<16x128xf32>
    %45 = arith.subf %44, %3 : vector<16x128xf32>
    %46 = math.absf %45 : vector<16x128xf32>
    %cst_12 = arith.constant 1.000000e+00 : f32
    %47 = vector.broadcast %cst_12 : f32 to vector<16x128xf32>
    %48 = arith.subf %47, %46 : vector<16x128xf32>
    %cst_13 = arith.constant 0.000000e+00 : f32
    %49 = vector.broadcast %cst_13 : f32 to vector<16x128xf32>
    %50 = arith.maximumf %48, %49 : vector<16x128xf32>
    %c0_14 = arith.constant 0 : index
    %c0_15 = arith.constant 0 : index
    %c0_16 = arith.constant 0 : index
    %51 = vector.load %arg3[%c0_14, %c0_15, %c0_16] : memref<2x64x16xf32, #tpu.memory_space<vmem>>, vector<1x64x16xf32>
    %52 = vector.shape_cast %51 : vector<1x64x16xf32> to vector<64x16xf32>
    %cst_17 = arith.constant dense<0.000000e+00> : vector<64x128xf32>
    %53 = tpu.matmul %52, %43, %cst_17 {dimension_numbers = #tpu.dot_dimension_numbers<[1], [0], [0], [1], [0, 0, 1, 1], [], []>} : vector<64x16xf32>, vector<16x128xf32>, vector<64x128xf32> -> vector<64x128xf32>
    %54 = tpu.concatenate %50, %50, %50, %50 in 0 : vector<16x128xf32>, vector<16x128xf32>, vector<16x128xf32>, vector<16x128xf32> -> vector<64x128xf32>
    %55 = arith.mulf %53, %54 : vector<64x128xf32>
    %cst_18 = arith.constant dense<0.000000e+00> : vector<4x128xf32>
    %56 = tpu.matmul %16, %55, %cst_18 {dimension_numbers = #tpu.dot_dimension_numbers<[1], [0], [0], [1], [0, 0, 1, 1], [], []>} : vector<4x64xf32>, vector<64x128xf32>, vector<4x128xf32> -> vector<4x128xf32>
    %c0_19 = arith.constant 0 : index
    %c0_20 = arith.constant 0 : index
    %c0_21 = arith.constant 0 : index
    %57 = vector.load %arg4[%c0_19, %c0_20, %c0_21] : memref<2x4x128xf32, #tpu.memory_space<vmem>>, vector<1x4x128xf32>
    %58 = vector.shape_cast %57 : vector<1x4x128xf32> to vector<4x128xf32>
    %59 = vector.shape_cast %56 : vector<4x128xf32> to vector<1x4x128xf32>
    tpu.vector_store %arg4[%c0_19, %c0_20, %c0_21], %59 {strides = array<i32>} : memref<2x4x128xf32, #tpu.memory_space<vmem>>, vector<1x4x128xf32>,
    %c1 = arith.constant 1 : index
    %c0_22 = arith.constant 0 : index
    %c0_23 = arith.constant 0 : index
    %60 = vector.load %arg2[%c1, %c0_22, %c0_23] : memref<2x2x128xf32, #tpu.memory_space<vmem>>, vector<1x2x128xf32>
    %61 = vector.shape_cast %60 : vector<1x2x128xf32> to vector<2x128xf32>
    %62 = vector.extract_strided_slice %61 {offsets = [0, 0], sizes = [1, 128], strides = [1, 1]} : vector<2x128xf32> to vector<1x128xf32>
    %cst_24 = arith.constant 1.000000e+00 : f32
    %63 = vector.broadcast %cst_24 : f32 to vector<1x128xf32>
    %64 = arith.addf %62, %63 : vector<1x128xf32>
    %cst_25 = arith.constant 1.600000e+01 : f32
    %65 = vector.broadcast %cst_25 : f32 to vector<1x128xf32>
    %66 = arith.mulf %64, %65 : vector<1x128xf32>
    %cst_26 = arith.constant 1.000000e+00 : f32
    %67 = vector.broadcast %cst_26 : f32 to vector<1x128xf32>
    %68 = arith.subf %66, %67 : vector<1x128xf32>
    %cst_27 = arith.constant 5.000000e-01 : f32
    %69 = vector.broadcast %cst_27 : f32 to vector<1x128xf32>
    %70 = arith.mulf %68, %69 : vector<1x128xf32>
    %71 = vector.extract_strided_slice %61 {offsets = [1, 0], sizes = [1, 128], strides = [1, 1]} : vector<2x128xf32> to vector<1x128xf32>
    %cst_28 = arith.constant 1.000000e+00 : f32
    %72 = vector.broadcast %cst_28 : f32 to vector<1x128xf32>
    %73 = arith.addf %71, %72 : vector<1x128xf32>
    %cst_29 = arith.constant 1.600000e+01 : f32
    %74 = vector.broadcast %cst_29 : f32 to vector<1x128xf32>
    %75 = arith.mulf %73, %74 : vector<1x128xf32>
    %cst_30 = arith.constant 1.000000e+00 : f32
    %76 = vector.broadcast %cst_30 : f32 to vector<1x128xf32>
    %77 = arith.subf %75, %76 : vector<1x128xf32>
    %cst_31 = arith.constant 5.000000e-01 : f32
    %78 = vector.broadcast %cst_31 : f32 to vector<1x128xf32>
    %79 = arith.mulf %77, %78 : vector<1x128xf32>
    %80 = vector.broadcast %70 : vector<1x128xf32> to vector<16x128xf32>
    %81 = arith.subf %80, %1 : vector<16x128xf32>
    %82 = math.absf %81 : vector<16x128xf32>
    %cst_32 = arith.constant 1.000000e+00 : f32
    %83 = vector.broadcast %cst_32 : f32 to vector<16x128xf32>
    %84 = arith.subf %83, %82 : vector<16x128xf32>
    %cst_33 = arith.constant 0.000000e+00 : f32
    %85 = vector.broadcast %cst_33 : f32 to vector<16x128xf32>
    %86 = arith.maximumf %84, %85 : vector<16x128xf32>
    %87 = vector.broadcast %79 : vector<1x128xf32> to vector<16x128xf32>
    %88 = arith.subf %87, %3 : vector<16x128xf32>
    %89 = math.absf %88 : vector<16x128xf32>
    %cst_34 = arith.constant 1.000000e+00 : f32
    %90 = vector.broadcast %cst_34 : f32 to vector<16x128xf32>
    %91 = arith.subf %90, %89 : vector<16x128xf32>
    %cst_35 = arith.constant 0.000000e+00 : f32
    %92 = vector.broadcast %cst_35 : f32 to vector<16x128xf32>
    %93 = arith.maximumf %91, %92 : vector<16x128xf32>
    %c1_36 = arith.constant 1 : index
    %c0_37 = arith.constant 0 : index
    %c0_38 = arith.constant 0 : index
    %94 = vector.load %arg3[%c1_36, %c0_37, %c0_38] : memref<2x64x16xf32, #tpu.memory_space<vmem>>, vector<1x64x16xf32>
    %95 = vector.shape_cast %94 : vector<1x64x16xf32> to vector<64x16xf32>
    %cst_39 = arith.constant dense<0.000000e+00> : vector<64x128xf32>
    %96 = tpu.matmul %95, %86, %cst_39 {dimension_numbers = #tpu.dot_dimension_numbers<[1], [0], [0], [1], [0, 0, 1, 1], [], []>} : vector<64x16xf32>, vector<16x128xf32>, vector<64x128xf32> -> vector<64x128xf32>
    %97 = tpu.concatenate %93, %93, %93, %93 in 0 : vector<16x128xf32>, vector<16x128xf32>, vector<16x128xf32>, vector<16x128xf32> -> vector<64x128xf32>
    %98 = arith.mulf %96, %97 : vector<64x128xf32>
    %cst_40 = arith.constant dense<0.000000e+00> : vector<4x128xf32>
    %99 = tpu.matmul %16, %98, %cst_40 {dimension_numbers = #tpu.dot_dimension_numbers<[1], [0], [0], [1], [0, 0, 1, 1], [], []>} : vector<4x64xf32>, vector<64x128xf32>, vector<4x128xf32> -> vector<4x128xf32>
    %c1_41 = arith.constant 1 : index
    %c0_42 = arith.constant 0 : index
    %c0_43 = arith.constant 0 : index
    %100 = vector.load %arg4[%c1_41, %c0_42, %c0_43] : memref<2x4x128xf32, #tpu.memory_space<vmem>>, vector<1x4x128xf32>
    %101 = vector.shape_cast %100 : vector<1x4x128xf32> to vector<4x128xf32>
    %102 = vector.shape_cast %99 : vector<4x128xf32> to vector<1x4x128xf32>
    tpu.vector_store %arg4[%c1_41, %c0_42, %c0_43], %102 {strides = array<i32>} : memref<2x4x128xf32, #tpu.memory_space<vmem>>, vector<1x4x128xf32>,
    return
  }
  func.func @transform_0(%arg0: i32, %arg1: i32) -> (i32, i32, i32) {
    %c0_i32 = arith.constant 0 : i32
    %c0_i32_0 = arith.constant 0 : i32
    return %arg0, %c0_i32, %arg1 : i32, i32, i32
  }
  func.func @transform_1(%arg0: i32, %arg1: i32) -> (i32, i32, i32) {
    %c0_i32 = arith.constant 0 : i32
    %c0_i32_0 = arith.constant 0 : i32
    %c0_i32_1 = arith.constant 0 : i32
    return %arg0, %c0_i32, %c0_i32_0 : i32, i32, i32
  }
  func.func @transform_2(%arg0: i32, %arg1: i32) -> (i32, i32, i32) {
    %c0_i32 = arith.constant 0 : i32
    %c0_i32_0 = arith.constant 0 : i32
    return %arg0, %c0_i32, %arg1 : i32, i32, i32
  }
}

</mosaic_0001>

<bundles_post_ra>
// kernel: tpu_custom_call.1
= control target key start
LH: loop header
LB: loop body
LE: loop exit
PB: predicated region body
PF: predicated region fallthrough
CT: control target
= control target key end

     0   :  { %7 = vsyncpa [#allocation4], 0  ;;  %s1438_s0 = inlined_call_operand.vmem [shape: f32[2,2,256], index: 0, kind: input, shape index: {}]   ;;  %s1439_s1 = inlined_call_operand.vmem [shape: f32[2,64,16], index: 1, kind: input, shape index: {}]   ;;  %s1440_s2 = inlined_call_operand.hbm [shape: f32[2,4,256], index: 2, kind: output, shape index: {}]  }
   0x1   :  { %9 = vsyncpa [#allocation4 + $0x1], 0  ;;  %s1197_s9 = smov 0   ;;  %s1199_s10 = smov 0  }
   0x2   :  { %s1201_s11 = smov 0   ;;  %s1203_s12 = smov 0  }
   0x3   :  { %s1205_s13 = smov 0   ;;  %s1207_s14 = smov 0  }
   0x4 LB: > { %s849_s15 = sadd.s32 4294967295, %s1173_s14   ;;  %s850_s16 = sadd.s32 4294967294, %s1173_s14   ;;  %s1173_s14 = sphi %s1207_s14, %s15_s14   ;;  %s1169_s13 = sphi %s1205_s13, %s1451_s13   ;;  %s1165_s12 = sphi %s1203_s12, %s1450_s12   ;;  %s1161_s11 = sphi %s1201_s11, %s1449_s11   ;;  %s1157_s10 = sphi %s1199_s10, %s1448_s10   ;;  %s1153_s9 = sphi %s1197_s9, %s1447_s9  }
   0x5   : > { %s24_s17 = sadd.s32 1, %s1169_s13  ;;  %s36_s18 = sadd.s32 1, %s1161_s11 }
   0x6   : > { %p25_p0 = scmp.ge.s32.totalorder %s24_s17, 2  ;;  %p43_p1 = scmp.ne.s32.totalorder %s1161_s11, %s1157_s10 }
   0x7   : > { %p44_p2 = scmp.eq.s32.totalorder %s1173_s14, 0  ;;  %p101_p3 = scmp.eq.s32.totalorder %s849_s15, 1 }
   0x8   : > { %s1453_s17 = smov (%p25_p0, %s24_s17), 0  ;;  %p106_p6 = scmp.ne.s32.totalorder %s1157_s10, %s1153_s9 }
   0x9   : > { %p45_p4 = por %p44_p2, %p43_p1  ;;  %p1236_p5 = por %p101_p3, %p43_p1 }
   0xa   : > { %s32_s20 = ssub.s32 %s1169_s13, %s1453_s17  ;;  %p107_p8 = scmp.eq.s32.totalorder %s850_s16, 1 }
   0xb   : > { %p34_p7 = scmp.eq.s32.totalorder %s32_s20, 0  ;;  %p853_p10 = scmp.ge.s32.totalorder %s1173_s14, 2 }
   0xc   : > { %p1247_p9 = por %p107_p8, %p106_p6 }
   0xd   : > { %s1245_s21 = scalar_select %p34_p7, %s1161_s11, %s36_s18  }
   0xe   : > { %133 = sbr.rel (%p853_p10) target bundleno = 28 (0x1c), region = 20 }
  0x15   : > { %136 = sbr.rel (!%p45_p4) target bundleno = 28 (0x1c), region = 24  ;;  %s138_s23 = sand.u32 (%p45_p4), 1, %s1161_s11  }
  0x16   : > { %s855_s24 = sshll.u32 (%p45_p4), %s1169_s13, 1  ;;  %s854_s25 = sshll.u32 (%p45_p4), %s138_s23, 2 }
  0x17   : > { %s145_s28 = scalar_lea.vmem (%p45_p4), %s1438_s0, %s855_s24  ;;  %s140_s29 = scalar_lea.vmem (%p45_p4), [#allocation2], %s854_s25 }
  0x18   : > { %v161_v0 = vld [vmem:[%s145_s28] sm:$0x3] (%p45_p4)  ;;  %v163_v1 = vld [vmem:[%s145_s28 + $0x4] sm:$0x3] (%p45_p4) }
  0x19   : > { %162 = vst [vmem:[%s140_s29] sm:$0x3] (%p45_p4), %v161_v0  ;;  %164 = vst [vmem:[%s140_s29 + $0x2] sm:$0x3] (%p45_p4), %v163_v1 }
  0x1c PF: > { %p856_p11 = scmp.ge.s32.totalorder %s1173_s14, 1  ;;  %p182_p12 = scmp.lt.s32.totalorder %s1173_s14, 3 }
  0x1e   : > { %p183_p13 = pnand %p856_p11, %p182_p12 }
  0x1f   : > { %s1262_s30 = sand.u32 (!%p183_p13), 1, %s1157_s10   ;;  %v225_v2 = vlaneseq (!%p183_p13)  ;;  %v269_v3 = vld [vmem:[%s1439_s1] sm:$0xff] (!%p183_p13)  ;;  %vm277_vm0 = vcmask (!%p183_p13), 130048   ;;  %v270_v39 = vld [vmem:[%s1439_s1 + $0x8] sm:$0xff] (!%p183_p13)  ;;  %v271_v40 = vld [vmem:[%s1439_s1 + $0x10] sm:$0xff] (!%p183_p13)  ;;  %v1175_v54 = vmov (!%p183_p13), 0.0|0.0  }
  0x20   : > { %186 = sbr.rel (%p183_p13) target bundleno = 535 (0x217), region = 58  ;;  %s857_s5 = sshll.u32 (!%p183_p13), %s1262_s30, 2  ;;  %936 = vmatprep.mubr.msk.f32.mxu0 (!%p183_p13), %vm277_vm0, %v269_v3  ;;  %v272_v41 = vld [vmem:[%s1439_s1 + $0x18] sm:$0xff] (!%p183_p13)  ;;  %v273_v42 = vld [vmem:[%s1439_s1 + $0x20] sm:$0xff] (!%p183_p13)  ;;  %v274_v43 = vld [vmem:[%s1439_s1 + $0x28] sm:$0xff] (!%p183_p13)  ;;  %1006 = vmatprep.subr.bf16.mxu1 (!%p183_p13), %v1175_v54  ;;  %vm1176_vm1 = vmmov (!%p183_p13), 0  }
  0x21   : > { %v1270_v4 = vshrl.u32 (!%p183_p13), %v225_v2, 7  ;;  %s191_s6 = scalar_lea.vmem (!%p183_p13), [#allocation2], %s857_s5  ;;  %v275_v44 = vld [vmem:[%s1439_s1 + $0x30] sm:$0xff] (!%p183_p13)  ;;  %v276_v45 = vld [vmem:[%s1439_s1 + $0x38] sm:$0xff] (!%p183_p13)  ;;  %v872_v46 = vld [vmem:[%s1439_s1 + $0x40] sm:$0xff] (!%p183_p13)  ;;  %v1177_v55 = vmov (!%p183_p13), 0.0  }
  0x22   : > { %v240_v5 = vld [vmem:[%s191_s6] sm:$0x3] (!%p183_p13)  ;;  %v870_v6 = vld [vmem:[%s191_s6 + $0x2] sm:$0x3] (!%p183_p13)  ;;  %v873_v47 = vld [vmem:[%s1439_s1 + $0x48] sm:$0xff] (!%p183_p13)  ;;  %964 = vmatprep.mubr.msk.f32.mxu1 (!%p183_p13), %vm1176_vm1, %v1177_v55  ;;  %vm415_vm5 = vcmask (!%p183_p13), 523264  }
  0x23   : > { %v241_v7 = vadd.f32 (!%p183_p13), 1.0, %v240_v5  ;;  %v492_v8 = vadd.f32 (!%p183_p13), 1.0, %v870_v6  ;;  %v227_v9 = vadd.s32 (!%p183_p13), 8, %v1270_v4  ;;  %v247_v13 = vsub.s32 (!%p183_p13), 0, %v1270_v4  ;;  %v874_v48 = vld [vmem:[%s1439_s1 + $0x50] sm:$0xff] (!%p183_p13)  ;;  %v875_v49 = vld [vmem:[%s1439_s1 + $0x58] sm:$0xff] (!%p183_p13) }
  0x24   : > { %v1275_v15 = vcvt.s32.f32 (!%p183_p13), %v1270_v4  ;;  %v876_v50 = vld [vmem:[%s1439_s1 + $0x60] sm:$0xff] (!%p183_p13)  ;;  %v877_v51 = vld [vmem:[%s1439_s1 + $0x68] sm:$0xff] (!%p183_p13)  ;;  %v878_v52 = vld [vmem:[%s1439_s1 + $0x70] sm:$0xff] (!%p183_p13)  ;;  %v259_v56 = vsub.s32 (!%p183_p13), 1, %v1270_v4  ;;  %s858_s3 = sshll.u32 (!%p183_p13), %s1262_s30, 3  ;;  %s891_s6 = sshll.u32 (!%p183_p13), %s1165_s12, 6 }
  0x25   : > { %v242_v10 = vmul.f32 (!%p183_p13), 16.0, %v241_v7  ;;  %v493_v11 = vmul.f32 (!%p183_p13), 16.0, %v492_v8  ;;  %v1277_v16 = vcvt.s32.f32 (!%p183_p13), %v227_v9  ;;  %v879_v53 = vld [vmem:[%s1439_s1 + $0x78] sm:$0xff] (!%p183_p13)  ;;  %s215_s4 = scalar_lea.vmem (!%p183_p13), [#allocation3], %s858_s3  ;;  %s1389_s15 = scalar_lea.hbm (!%p183_p13), %s1440_s2, %s891_s6 }
  0x26   : > { %s754_s5 = sshll.u32 (!%p183_p13), %s215_s4, 4  ;;  %s739_s16 = scalar_lea.sflag (!%p183_p13), [#allocation4], %s1262_s30  ;;  %s1384_s5 = int_to_ptr.vmem [resolvable:$true] %s754_s5 }
  0x27   : > { %v860_v12 = vadd.f32 -1.0, %v242_v10  ;;  %v871_v14 = vadd.f32 -1.0, %v493_v11  ;;  %s1095_s18 = scalar_lea.vmem %s1384_s5, 128  ;;  %s1178_s12 = smov [#allocation3]  }
  0x28   : > { %p1096_p0 = scmp.ne.s32.totalorder %s1384_s5, %s1095_s18  ;;  %s1099_s20 = sshll.u32 %s1178_s12, 4  ;;  %s1100_s20 = int_to_ptr.vmem [resolvable:$false] %s1099_s20 }
  0x29   : > { %v244_v17 = vmul.f32 0.5, %v860_v12  ;;  %v1279_v18 = vmul.f32 0.5, %v871_v14  ;;  %s1101_s23 = scalar_lea.vmem %s1100_s20, 256  ;;  %p1102_p3 = scmp.lt.s32.totalorder %s1384_s5, %s1100_s20 }
  0x2a   : > { %p1097_p1 = pnand %p1096_p0, %p1236_p5  ;;  %p1103_p4 = scmp.lt.s32.totalorder %s1101_s23, %s1095_s18 }
  0x2b   : > { %v248_v19 = vrot.slane %v244_v17, %v247_v13  ;;  %v499_v20 = vrot.slane %v1279_v18, %v247_v13  ;;  %v260_v57 = vrot.slane %v244_v17, %v259_v56  ;;  %v511_v1 = vrot.slane %v1279_v18, %v259_v56 }
  0x2c   : > { %v234_v13 = vadd.s32 1, %v1270_v4  ;;  %p1098_p2 = pneg %p1097_p1  ;;  %p1104_p6 = por %p1103_p4, %p1102_p3 }
  0x2d   : > { %v249_v21 = vsub.f32 %v248_v19, %v1275_v15  ;;  %v250_v22 = vsub.f32 %v248_v19, %v1277_v16  ;;  %v500_v23 = vsub.f32 %v499_v20, %v1275_v15  ;;  %v501_v24 = vsub.f32 %v499_v20, %v1277_v16 }
  0x2e   : > { %v262_v58 = vsub.f32 %v260_v57, %v1277_v16  ;;  %v261_v59 = vsub.f32 %v260_v57, %v1275_v15  ;;  %v513_v8 = vsub.f32 %v511_v1, %v1277_v16  ;;  %v512_v10 = vsub.f32 %v511_v1, %v1275_v15  ;;  %p1105_p7 = pnand %p1104_p6, %p1098_p2 }
  0x2f   : > { %v251_v25 = vand.u32 2147483647, %v249_v21  ;;  %v252_v26 = vand.u32 2147483647, %v250_v22  ;;  %v502_v27 = vand.u32 2147483647, %v500_v23 }
  0x30   : > { %v503_v28 = vand.u32 2147483647, %v501_v24  ;;  %v264_v60 = vand.u32 2147483647, %v262_v58  ;;  %v263_v61 = vand.u32 2147483647, %v261_v59 }
  0x31   : > { %v253_v29 = vsub.f32 1.0, %v251_v25  ;;  %v254_v30 = vsub.f32 1.0, %v252_v26  ;;  %v504_v31 = vsub.f32 1.0, %v502_v27  ;;  %v515_v19 = vand.u32 2147483647, %v513_v8 }
  0x32   : > { %v505_v32 = vsub.f32 1.0, %v503_v28  ;;  %v266_v62 = vsub.f32 1.0, %v264_v60  ;;  %v265_v63 = vsub.f32 1.0, %v263_v61  ;;  %v514_v21 = vand.u32 2147483647, %v512_v10 }
  0x33   : > { %v255_v33 = vmax.f32 %v253_v29, 0.0  ;;  %v256_v34 = vmax.f32 %v254_v30, 0.0  ;;  %v506_v35 = vmax.f32 %v504_v31, 0.0  ;;  %v231_v23 = vand.u32 127, %v225_v2 }
  0x34   : > { %v507_v36 = vmax.f32 %v505_v32, 0.0  ;;  %v268_v0 = vmax.f32 %v266_v62, 0.0  ;;  %v267_v3 = vmax.f32 %v265_v63, 0.0  ;;  %v232_v16 = vmul.u32 16, %v1270_v4 }
  0x35   : > { %v1002_v37 = vpack.c.bf16 %v256_v34, %v255_v33  ;;  %v235_v24 = vmul.u32 16, %v234_v13  ;;  %v517_v26 = vsub.f32 1.0, %v515_v19  ;;  %v516_v28 = vsub.f32 1.0, %v514_v21 }
  0x36   : > { %v1018_v38 = vpack.c.bf16 %v507_v36, %v506_v35  ;;  %vm1360_vm2 = vcmp.ge.s32.totalorder %v231_v23, %v232_v16 }
  0x37   : > { %1003 = vmatprep.subr.bf16.mxu0 %v1002_v37  ;;  %vm1364_vm3 = vcmp.lt.s32.totalorder %v231_v23, %v235_v24  ;;  %v519_v33 = vmax.f32 %v517_v26, 0.0  ;;  %v518_v35 = vmax.f32 %v516_v28, 0.0 }
  0x38   : > { %1005 = vmatpush3.bf16.msra.mxu0 %v1002_v37  ;;  %vm237_vm4 = vmand %vm1360_vm2, %vm1364_vm3 }
  0x39   : > { %1019 = vmatprep.subr.bf16.mxu0 %v1018_v38 }
  0x3b   : > { %937 = vmatmul.mubr.msk.f32.vlgmr.msra.gmra.mrb[0].mxu0 %vm277_vm0, %v270_v39 }
  0x3c   : > { %1021 = vmatpush3.bf16.msra.mxu0 %v1018_v38  ;;  %939 = vmatprep.mubr.msk.f32.mxu0 %vm277_vm0, %v271_v40 }
  0x3f   : > { %940 = vmatmul.mubr.msk.f32.gmra.mrb[2].mxu0 %vm277_vm0, %v272_v41  ;;  %v859_v41 = vsel %vm237_vm4, 1.0, %v1177_v55 }
  0x40   : > { %942 = vmatprep.mubr.msk.f32.mxu0 %vm277_vm0, %v273_v42 }
  0x43   : > { %943 = vmatmul.mubr.msk.f32.gmra.mrb[4].mxu0 %vm277_vm0, %v274_v43 }
  0x44   : > { %945 = vmatprep.mubr.msk.f32.mxu0 %vm277_vm0, %v275_v44 }
  0x47   : > { %946 = vmatmul.mubr.msk.f32.gmra.mrb[6].mxu0 %vm277_vm0, %v276_v45 }
  0x48   : > { %971 = vmatprep.mubr.msk.f32.mxu0 %vm277_vm0, %v872_v46 }
  0x4b   : > { %972 = vmatmul.mubr.msk.f32.vlgmr.msra.gmra.mrb[8].mxu0 %vm277_vm0, %v873_v47 }
  0x4c   : > { %974 = vmatprep.mubr.msk.f32.mxu0 %vm277_vm0, %v874_v48 }
  0x4f   : > { %975 = vmatmul.mubr.msk.f32.gmra.mrb[10].mxu0 %vm277_vm0, %v875_v49 }
  0x50   : > { %977 = vmatprep.mubr.msk.f32.mxu0 %vm277_vm0, %v876_v50 }
  0x53   : > { %978 = vmatmul.mubr.msk.f32.gmra.mrb[12].mxu0 %vm277_vm0, %v877_v51 }
  0x54   : > { %980 = vmatprep.mubr.msk.f32.mxu0 %vm277_vm0, %v878_v52 }
  0x57   : > { %981 = vmatmul.mubr.msk.f32.gmra.mrb[14].mxu0 %vm277_vm0, %v879_v53 }
 0x10e   : > { %v938_v5 = vpop.f32.mrb[0].mxu0 }
 0x10f   : > { %v408_v6 = vmul.f32 %v938_v5, %v268_v0  ;;  %v368_v7 = vpop.f32.mrb[1].mxu0 }
 0x110   : > { %v407_v9 = vmul.f32 %v368_v7, %v267_v3 }
 0x112   : > { %v941_v11 = vpop.f32.mrb[2].mxu0  ;;  %v1007_v12 = vpack.c.bf16 %v408_v6, %v407_v9 }
 0x113   : > { %v410_v14 = vmul.f32 %v941_v11, %v268_v0  ;;  %v378_v17 = vpop.f32.mrb[3].mxu0 }
 0x114   : > { %v409_v20 = vmul.f32 %v378_v17, %v267_v3  ;;  %1008 = vmatpush3.bf16.msra.mxu1 %v1007_v12 }
 0x115   : > { %1009 = vmatprep.subr.bf16.mxu1 %v1175_v54 }
 0x116   : > { %v1010_v18 = vpack.c.bf16 %v410_v14, %v409_v20  ;;  %v944_v22 = vpop.f32.mrb[4].mxu0 }
 0x117   : > { %v412_v15 = vmul.f32 %v944_v22, %v268_v0  ;;  %v388_v25 = vpop.f32.mrb[5].mxu0 }
 0x118   : > { %v411_v27 = vmul.f32 %v388_v25, %v267_v3  ;;  %1011 = vmatpush3.bf16.msra.mxu1 %v1010_v18 }
 0x119   : > { %1012 = vmatprep.subr.bf16.mxu1 %v1175_v54 }
 0x11a   : > { %v1013_v29 = vpack.c.bf16 %v412_v15, %v411_v27  ;;  %v947_v30 = vpop.f32.mrb[6].mxu0 }
 0x11b   : > { %v414_v2 = vmul.f32 %v947_v30, %v268_v0  ;;  %v398_v4 = vpop.f32.mrb[7].mxu0 }
 0x11c   : > { %v413_v34 = vmul.f32 %v398_v4, %v267_v3  ;;  %1014 = vmatpush3.bf16.msra.mxu1 %v1013_v29 }
 0x11d   : > { %1015 = vmatprep.subr.bf16.mxu1 %v1175_v54 }
 0x11e   : > { %v1016_v36 = vpack.c.bf16 %v414_v2, %v413_v34  ;;  %v973_v37 = vpop.f32.mrb[8].mxu0 }
 0x11f   : > { %v659_v38 = vmul.f32 %v973_v37, %v519_v33  ;;  %v619_v39 = vpop.f32.mrb[9].mxu0 }
 0x120   : > { %v658_v40 = vmul.f32 %v619_v39, %v518_v35  ;;  %1017 = vmatpush3.bf16.msra.mxu1 %v1016_v36 }
 0x121   : > { %1022 = vmatprep.subr.bf16.mxu1 %v1175_v54 }
 0x122   : > { %v1023_v42 = vpack.c.bf16 %v659_v38, %v658_v40  ;;  %v976_v43 = vpop.f32.mrb[10].mxu0 }
 0x123   : > { %v661_v44 = vmul.f32 %v976_v43, %v519_v33  ;;  %v629_v45 = vpop.f32.mrb[11].mxu0  ;;  %965 = vmatmul.mubr.msk.f32.vlgmr.msra.gmra.mrb[0].mxu1 %vm415_vm5, %v859_v41 }
 0x124   : > { %v660_v46 = vmul.f32 %v629_v45, %v518_v35  ;;  %1024 = vmatpush3.bf16.msra.mxu1 %v1023_v42  ;;  %999 = vmatprep.mubr.msk.f32.mxu1 %vm1176_vm1, %v1177_v55 }
 0x125   : > { %1025 = vmatprep.subr.bf16.mxu1 %v1175_v54 }
 0x126   : > { %v1026_v47 = vpack.c.bf16 %v661_v44, %v660_v46  ;;  %v979_v48 = vpop.f32.mrb[12].mxu0 }
 0x127   : > { %v663_v49 = vmul.f32 %v979_v48, %v519_v33  ;;  %v639_v50 = vpop.f32.mrb[13].mxu0 }
 0x128   : > { %v662_v51 = vmul.f32 %v639_v50, %v518_v35  ;;  %1027 = vmatpush3.bf16.msra.mxu1 %v1026_v47 }
 0x129   : > { %1028 = vmatprep.subr.bf16.mxu1 %v1175_v54 }
 0x12a   : > { %v1029_v52 = vpack.c.bf16 %v663_v49, %v662_v51  ;;  %v982_v53 = vpop.f32.mrb[14].mxu0 }
 0x12b   : > { %v665_v56 = vmul.f32 %v982_v53, %v519_v33  ;;  %v649_v57 = vpop.f32.mrb[15].mxu0 }
 0x12c   : > { %v664_v58 = vmul.f32 %v649_v57, %v518_v35  ;;  %1030 = vmatpush3.bf16.msra.mxu1 %v1029_v52 }
 0x12d   : > { %1031 = vmatprep.subr.bf16.mxu1 %v1175_v54 }
 0x12e   : > { %v1032_v55 = vpack.c.bf16 %v665_v56, %v664_v58 }
 0x130   : > { %1033 = vmatpush3.bf16.msra.mxu1 %v1032_v55 }
 0x133   : > { %1000 = vmatmul.mubr.msk.f32.vlgmr.msra.gmra.mrb[2].mxu1 %vm415_vm5, %v859_v41 }
 0x1f6   : > { %v485_v59 = vpop.f32.mrb[0].mxu1 }
 0x1f7   : > { %489 = vst [vmem:[%s215_s4] sm:$0xf] %v485_v59  ;;  %v966_v60 = vpop.f32.mrb[1].mxu1 }
 0x206   : > { %v732_v54 = vpop.f32.mrb[2].mxu1 }
 0x207   : > { %889 = vst [vmem:[%s215_s4 + $0x4] sm:$0xf] %v732_v54  ;;  %v1001_v61 = vpop.f32.mrb[3].mxu1 }
 0x208   : > { %1108 = shalt.err (!%p1105_p7)
}
 0x209   : > { %s1109_s24 = scalar_lea.hbm %s1389_s15, 128  ;;  %s1113_s27 = scalar_lea.hbm %s1440_s2, 256 }
 0x20a   : > { %p1110_p8 = scmp.ne.s32.totalorder %s1389_s15, %s1109_s24  ;;  %p1114_p13 = scmp.lt.u32.totalorder %s1389_s15, %s1440_s2 }
 0x20b   : > { %p1115_p0 = scmp.lt.u32.totalorder %s1113_s27, %s1109_s24  ;;  %p1117_p2 = scmp.lt.u32.totalorder %s1109_s24, %s1389_s15 }
 0x20c   : > { %p1111_p11 = pnand %p1110_p8, %p1236_p5 }
 0x20d   : > { %p1116_p1 = por %p1115_p0, %p1114_p13 }
 0x20e   : > { %p1112_p12 = pneg %p1111_p11 }
 0x20f   : > { %p1118_p3 = por %p1117_p2, %p1116_p1 }
 0x211   : > { %p1119_p4 = pnand %p1118_p3, %p1112_p12 }
 0x213   : > { %1122 = shalt.err (!%p1119_p4)
}
 0x214   : > { %s1179_s3 = smov 64   ;;  %s1180_s4 = smov 128  }
 0x215   : > { %s1181_s6 = smov 4  }
 0x216   : > { %1034 = dma.vmem_to_hbm [thread:$0]  (%p1236_p5), %s1384_s5, 128, %s1389_s15, %s739_s16, %s1179_s3, %s1180_s4, %s1181_s6  }
 0x217 PF: > { %s769_s7 = sand.u32 1, %s1153_s9   ;;  %p1037_p6 = pnand %p853_p10, %p1247_p9 }
 0x218   : > { %s770_s8 = scalar_lea.sflag [#allocation4], %s769_s7 }
 0x219   : > { %1148 = dma.done.wait (!%p1037_p6), %s770_s8, 128  }
 0x21a   : > { %1150 = vsyncadd (!%p1037_p6), %s770_s8, 4294967168  ;;  %s15_s14 = sadd.s32 1, %s1173_s14   ;;  %s1447_s9 = smov %s1157_s10 }
 0x21b   : > { %p12_p7 = scmp.ge.s32.totalorder %s15_s14, 4   ;;  %s1448_s10 = smov %s1161_s11 }
 0x21c   : > { %s1449_s11 = smov %s1245_s21  ;;  %s1450_s12 = smov %s1169_s13 }
 0x21d   : > { %s1451_s13 = smov %s1453_s17  ;;  %14 = sbr.rel (!%p12_p7) target bundleno = 4 (0x4), region = 108 }
 0x224   :  { %775 = vsyncpa [#allocation4], 1 }
 0x225   :  { %777 = vsyncpa [#allocation4 + $0x1], 1 }

</bundles_post_ra>
